<compile_context>
chip_gen: v7x
topology: tpu7x:2x2x1
jax: 0.10.0
libtpu: 0.0.40
codegen_flags: <defaults>
</compile_context>

<pallas_src>
import jax
import jax.numpy as jnp
import numpy as np
from jax import lax
from jax.experimental import pallas as pl
from jax.experimental.pallas import tpu as pltpu

KSIZE = 7            # SpatialAttention kernel_size=7
PAD = KSIZE // 2     # padding=3 ("same" conv)


def _cbam_kernel(x_ref, w1_ref, b1_ref, w2_ref, b2_ref, am_ref, ax_ref, bc_ref, o_ref):
    """One grid step: a (bblk, C, HW) lane-dense slab of the batch."""
    xs = x_ref[...].astype(jnp.float32)                   # (bblk, C, HW)

    # ---------------- Channel attention (ReLU gate, per module spec) ----------
    avg = jnp.mean(xs, axis=2)                             # (bblk, C)  lane reduce
    mxv = jnp.max(xs, axis=2)                              # (bblk, C)
    w1 = w1_ref[...]
    b1 = b1_ref[...]
    h_avg = jnp.maximum(jnp.dot(avg, w1, preferred_element_type=jnp.float32) + b1, 0.0)
    h_max = jnp.maximum(jnp.dot(mxv, w1, preferred_element_type=jnp.float32) + b1, 0.0)
    # fc(avg) + fc(max) == (relu(avg@W1+b1) + relu(max@W1+b1)) @ W2 + 2*b2
    fc_sum = (jnp.dot(h_avg + h_max, w2_ref[...], preferred_element_type=jnp.float32)
              + 2.0 * b2_ref[...])
    ca = jnp.maximum(fc_sum, 0.0)                          # (bblk, C)
    x1 = xs * ca[:, :, None]                               # x * channel_attention(x)

    # ---------------- Spatial attention (ReLU gate, per module spec) ----------
    mean_c = jnp.mean(x1, axis=1)                          # (bblk, HW) sublane reduce
    max_c = jnp.max(x1, axis=1)                            # (bblk, HW)
    # densified 7x7 "same" conv: two MXU matmuls, no concat temporaries
    conv = (jnp.dot(mean_c, am_ref[...], preferred_element_type=jnp.float32)
            + jnp.dot(max_c, ax_ref[...], preferred_element_type=jnp.float32)
            + bc_ref[0])
    sa = jnp.maximum(conv, 0.0)                            # (bblk, HW)

    o_ref[...] = (x1 * sa[:, None, :]).astype(o_ref.dtype)  # x * spatial_attn(x)


def pack_cbam_params(W1, b1, W2, b2, Wc, bc, H, W):
    """Host-side (numpy) weight repack, done ONCE at init -- no per-call scatter."""
    W1 = np.asarray(W1, np.float32)            # (HID, C)   Linear(C, C//16).weight
    b1 = np.asarray(b1, np.float32)
    W2 = np.asarray(W2, np.float32)            # (C, HID)   Linear(C//16, C).weight
    b2 = np.asarray(b2, np.float32)
    Wc = np.asarray(Wc, np.float32).reshape(2, KSIZE, KSIZE)   # Conv2d(2,1,7).weight
    bc = np.asarray(bc, np.float32).reshape(1)

    HID, C = W1.shape
    HW = H * W
    hid_p = max(8, ((HID + 7) // 8) * 8)       # pad hidden dim to a sublane multiple

    W1T = np.zeros((C, hid_p), np.float32); W1T[:, :HID] = W1.T
    b1r = np.zeros((1, hid_p), np.float32); b1r[0, :HID] = b1
    W2T = np.zeros((hid_p, C), np.float32); W2T[:HID, :] = W2.T
    b2r = b2.reshape(1, C)

    # Densify the zero-padded 7x7 conv (2 chan -> 1) into two (HW, HW) matrices:
    #   conv_out[b, o] = mean_c[b] @ A_mean[:, o] + max_c[b] @ A_max[:, o] + bc
    A = np.zeros((2 * HW, HW), np.float32)
    for cin in range(2):
        for ky in range(KSIZE):
            for kx in range(KSIZE):
                dy, dx = ky - PAD, kx - PAD
                ys = np.arange(max(0, -dy), min(H, H - dy))
                xcs = np.arange(max(0, -dx), min(W, W - dx))
                if ys.size == 0 or xcs.size == 0:
                    continue
                yy, xx = np.meshgrid(ys, xcs, indexing="ij")
                out_idx = (yy * W + xx).ravel()
                in_idx = ((yy + dy) * W + (xx + dx)).ravel()
                A[cin * HW + in_idx, out_idx] += Wc[cin, ky, kx]
    A_mean, A_max = A[:HW], A[HW:]

    return tuple(jnp.asarray(a) for a in (W1T, b1r, W2T, b2r, A_mean, A_max, bc))


def _pick_bblk(B, C, HW, itemsize, weight_bytes, budget_bytes=24 << 20):
    """Largest batch block that fits VMEM while keeping grid >= 2 (v7x: 2 TCs)."""
    best = 1
    for d in range(1, B + 1):
        if B % d:
            continue
        if B >= 2 and B // d < 2:
            continue                                      # keep >= 2 grid steps
        slab = 2 * 2 * d * C * HW * itemsize              # x in + out, double-buffered
        if weight_bytes + slab <= budget_bytes:
            best = d
    return best


@jax.jit
def cbam_pallas(x, params):
    """CBAM forward.  x: (B, C, H, W); params: tuple from pack_cbam_params()."""
    W1T, b1r, W2T, b2r, Am, Ax, bc1 = params
    B, C, H, W = x.shape
    HW = H * W
    assert Am.shape == (HW, HW) and Ax.shape == (HW, HW)

    weight_bytes = 4 * (W1T.size + b1r.size + W2T.size + b2r.size + Am.size + Ax.size)
    assert weight_bytes <= (20 << 20), "densified conv matrices too large for VMEM"

    itemsize = jnp.dtype(x.dtype).itemsize
    bblk = _pick_bblk(B, C, HW, itemsize, weight_bytes)
    x3 = x.reshape(B, C, HW)                               # lane-dense layout

    vmem_est = weight_bytes + 2 * 2 * bblk * C * HW * itemsize
    vmem_limit = int(min(max(2 * vmem_est + (4 << 20), 16 << 20), 32 << 20))

    # Grid-invariant operands: whole array resident in VMEM (single-buffered).
    vmem_whole = pl.BlockSpec(memory_space=pltpu.MemorySpace.VMEM)

    grid_spec = pltpu.PrefetchScalarGridSpec(
        num_scalar_prefetch=0,
        grid=(B // bblk,),
        in_specs=[
            pl.BlockSpec((bblk, C, HW), lambda b: (b, 0, 0)),   # x slab (pipelined)
            vmem_whole,                                         # W1^T  (C, hid_p)
            vmem_whole,                                         # b1    (1, hid_p)
            vmem_whole,                                         # W2^T  (hid_p, C)
            vmem_whole,                                         # b2    (1, C)
            vmem_whole,                                         # A_mean (HW, HW)
            vmem_whole,                                         # A_max  (HW, HW)
            pl.BlockSpec(memory_space=pltpu.MemorySpace.SMEM),  # conv bias (1,)
        ],
        out_specs=pl.BlockSpec((bblk, C, HW), lambda b: (b, 0, 0)),
    )
    out = pl.pallas_call(
        _cbam_kernel,
        out_shape=jax.ShapeDtypeStruct((B, C, HW), x.dtype),
        grid_spec=grid_spec,
        compiler_params=pltpu.CompilerParams(
            dimension_semantics=("parallel",),   # batch steps are independent
            vmem_limit_bytes=vmem_limit,
        ),
    )(x3, W1T, b1r, W2T, b2r, Am, Ax, bc1)
    return out.reshape(B, C, H, W)


def cbam_ref(x, W1, b1, W2, b2, Wc, bc):
    """Pure-JAX reference mirroring the PyTorch module (ReLU gates, per spec)."""
    hp = lax.Precision.HIGHEST
    avg = jnp.mean(x, axis=(2, 3))
    mx = jnp.max(x, axis=(2, 3))

    def fc(v):
        h = jax.nn.relu(jnp.dot(v, W1.T, precision=hp) + b1)
        return jnp.dot(h, W2.T, precision=hp) + b2

    ca = jax.nn.relu(fc(avg) + fc(mx))[:, :, None, None]
    x1 = x * ca
    s = jnp.concatenate([jnp.mean(x1, axis=1, keepdims=True),
                         jnp.max(x1, axis=1, keepdims=True)], axis=1)
    conv = lax.conv_general_dilated(
        s, Wc, window_strides=(1, 1), padding=[(PAD, PAD), (PAD, PAD)],
        dimension_numbers=("NCHW", "OIHW", "NCHW"),
        precision=hp) + bc.reshape(1, 1, 1, 1)
    sa = jax.nn.relu(conv)
    return x1 * sa


if __name__ == "__main__":
    B, C, H, W = 4, 32, 16, 16          # channels >= 16 so C // reduction_ratio >= 1
    HID = C // 16
    key = jax.random.PRNGKey(0)
    kx, k1, k2, k3, k4, k5, k6 = jax.random.split(key, 7)

    x = jax.random.normal(kx, (B, C, H, W), jnp.float32)
    W1 = jax.random.normal(k1, (HID, C), jnp.float32) * 0.2   # Linear(C, C//16).weight
    b1 = jax.random.normal(k2, (HID,), jnp.float32) * 0.1
    W2 = jax.random.normal(k3, (C, HID), jnp.float32) * 0.2   # Linear(C//16, C).weight
    b2 = jax.random.normal(k4, (C,), jnp.float32) * 0.1
    Wc = jax.random.normal(k5, (1, 2, KSIZE, KSIZE), jnp.float32) * 0.1  # Conv2d(2,1,7)
    bc = jax.random.normal(k6, (1,), jnp.float32) * 0.1

    params = pack_cbam_params(W1, b1, W2, b2, Wc, bc, H, W)   # once, at init
    out = jax.block_until_ready(cbam_pallas(x, params))
    ref = jax.block_until_ready(cbam_ref(x, W1, b1, W2, b2, Wc, bc))
    np.testing.assert_allclose(np.asarray(out), np.asarray(ref), atol=1e-3, rtol=1e-3)
    print("KERNEL_OK")
</pallas_src>

<mosaic_0001>
module attributes {stable_mosaic.version = 11 : i64} {
  func.func @_cbam_kernel(%arg0: i32, %arg1: memref<2x32x256xf32, #tpu.memory_space<vmem>>, %arg2: memref<32x8xf32, #tpu.memory_space<vmem>>, %arg3: memref<1x8xf32, #tpu.memory_space<vmem>>, %arg4: memref<8x32xf32, #tpu.memory_space<vmem>>, %arg5: memref<1x32xf32, #tpu.memory_space<vmem>>, %arg6: memref<256x256xf32, #tpu.memory_space<vmem>>, %arg7: memref<256x256xf32, #tpu.memory_space<vmem>>, %arg8: memref<1xf32, #tpu.memory_space<smem>>, %arg9: memref<2x32x256xf32, #tpu.memory_space<vmem>>) attributes {dimension_semantics = [#tpu.dimension_semantics<parallel>], iteration_bounds = array<i64: 2>, scalar_prefetch = 0 : i64, scratch_operands = 0 : i64, tpu.core_type = #tpu.core_type<tc>, window_params = [{transform_indices = @transform_0, window_bounds = array<i64: 2, 32, 256>}, {pipeline_mode = #tpu.pipeline_mode<synchronous>, transform_indices = @transform_1, window_bounds = array<i64: 32, 8>}, {pipeline_mode = #tpu.pipeline_mode<synchronous>, transform_indices = @transform_2, window_bounds = array<i64: 1, 8>}, {pipeline_mode = #tpu.pipeline_mode<synchronous>, transform_indices = @transform_3, window_bounds = array<i64: 8, 32>}, {pipeline_mode = #tpu.pipeline_mode<synchronous>, transform_indices = @transform_4, window_bounds = array<i64: 1, 32>}, {pipeline_mode = #tpu.pipeline_mode<synchronous>, transform_indices = @transform_5, window_bounds = array<i64: 256, 256>}, {pipeline_mode = #tpu.pipeline_mode<synchronous>, transform_indices = @transform_6, window_bounds = array<i64: 256, 256>}, {transform_indices = @transform_7, window_bounds = array<i64: 1>}, {transform_indices = @transform_8, window_bounds = array<i64: 2, 32, 256>}]} {
    %c0 = arith.constant 0 : index
    %c0_0 = arith.constant 0 : index
    %c0_1 = arith.constant 0 : index
    %0 = vector.load %arg1[%c0, %c0_0, %c0_1] : memref<2x32x256xf32, #tpu.memory_space<vmem>>, vector<2x32x256xf32>
    %cst = arith.constant dense<0.000000e+00> : vector<2x32xf32>
    %1 = vector.multi_reduction <add>, %0, %cst [2] : vector<2x32x256xf32> to vector<2x32xf32>
    %cst_2 = arith.constant 2.560000e+02 : f32
    %2 = vector.broadcast %cst_2 : f32 to vector<2x32xf32>
    %3 = arith.divf %1, %2 : vector<2x32xf32>
    %cst_3 = arith.constant dense<0xFF800000> : vector<2x32xf32>
    %4 = vector.multi_reduction <maximumf>, %0, %cst_3 [2] : vector<2x32x256xf32> to vector<2x32xf32>
    %c0_4 = arith.constant 0 : index
    %c0_5 = arith.constant 0 : index
    %5 = vector.load %arg2[%c0_4, %c0_5] : memref<32x8xf32, #tpu.memory_space<vmem>>, vector<32x8xf32>
    %c0_6 = arith.constant 0 : index
    %c0_7 = arith.constant 0 : index
    %6 = vector.load %arg3[%c0_6, %c0_7] : memref<1x8xf32, #tpu.memory_space<vmem>>, vector<1x8xf32>
    %cst_8 = arith.constant dense<0.000000e+00> : vector<2x8xf32>
    %7 = tpu.matmul %3, %5, %cst_8 {dimension_numbers = #tpu.dot_dimension_numbers<[1], [0], [0], [1], [0, 0, 1, 1], [], []>} : vector<2x32xf32>, vector<32x8xf32>, vector<2x8xf32> -> vector<2x8xf32>
    %8 = vector.broadcast %6 : vector<1x8xf32> to vector<2x8xf32>
    %9 = arith.addf %7, %8 : vector<2x8xf32>
    %cst_9 = arith.constant 0.000000e+00 : f32
    %10 = vector.broadcast %cst_9 : f32 to vector<2x8xf32>
    %11 = arith.maximumf %9, %10 : vector<2x8xf32>
    %cst_10 = arith.constant dense<0.000000e+00> : vector<2x8xf32>
    %12 = tpu.matmul %4, %5, %cst_10 {dimension_numbers = #tpu.dot_dimension_numbers<[1], [0], [0], [1], [0, 0, 1, 1], [], []>} : vector<2x32xf32>, vector<32x8xf32>, vector<2x8xf32> -> vector<2x8xf32>
    %13 = vector.broadcast %6 : vector<1x8xf32> to vector<2x8xf32>
    %14 = arith.addf %12, %13 : vector<2x8xf32>
    %cst_11 = arith.constant 0.000000e+00 : f32
    %15 = vector.broadcast %cst_11 : f32 to vector<2x8xf32>
    %16 = arith.maximumf %14, %15 : vector<2x8xf32>
    %17 = arith.addf %11, %16 : vector<2x8xf32>
    %c0_12 = arith.constant 0 : index
    %c0_13 = arith.constant 0 : index
    %18 = vector.load %arg4[%c0_12, %c0_13] : memref<8x32xf32, #tpu.memory_space<vmem>>, vector<8x32xf32>
    %cst_14 = arith.constant dense<0.000000e+00> : vector<2x32xf32>
    %19 = tpu.matmul %17, %18, %cst_14 {dimension_numbers = #tpu.dot_dimension_numbers<[1], [0], [0], [1], [0, 0, 1, 1], [], []>} : vector<2x8xf32>, vector<8x32xf32>, vector<2x32xf32> -> vector<2x32xf32>
    %c0_15 = arith.constant 0 : index
    %c0_16 = arith.constant 0 : index
    %20 = vector.load %arg5[%c0_15, %c0_16] : memref<1x32xf32, #tpu.memory_space<vmem>>, vector<1x32xf32>
    %cst_17 = arith.constant 2.000000e+00 : f32
    %21 = vector.broadcast %cst_17 : f32 to vector<1x32xf32>
    %22 = arith.mulf %21, %20 : vector<1x32xf32>
    %23 = vector.broadcast %22 : vector<1x32xf32> to vector<2x32xf32>
    %24 = arith.addf %19, %23 : vector<2x32xf32>
    %cst_18 = arith.constant 0.000000e+00 : f32
    %25 = vector.broadcast %cst_18 : f32 to vector<2x32xf32>
    %26 = arith.maximumf %24, %25 : vector<2x32xf32>
    %27 = vector.shape_cast %26 : vector<2x32xf32> to vector<2x32x1xf32>
    %28 = vector.broadcast %27 : vector<2x32x1xf32> to vector<2x32x256xf32>
    %29 = arith.mulf %0, %28 : vector<2x32x256xf32>
    %cst_19 = arith.constant dense<0.000000e+00> : vector<2x256xf32>
    %30 = vector.multi_reduction <add>, %29, %cst_19 [1] : vector<2x32x256xf32> to vector<2x256xf32>
    %cst_20 = arith.constant 3.200000e+01 : f32
    %31 = vector.broadcast %cst_20 : f32 to vector<2x256xf32>
    %32 = arith.divf %30, %31 : vector<2x256xf32>
    %cst_21 = arith.constant dense<0xFF800000> : vector<2x256xf32>
    %33 = vector.multi_reduction <maximumf>, %29, %cst_21 [1] : vector<2x32x256xf32> to vector<2x256xf32>
    %c0_22 = arith.constant 0 : index
    %c0_23 = arith.constant 0 : index
    %34 = vector.load %arg6[%c0_22, %c0_23] : memref<256x256xf32, #tpu.memory_space<vmem>>, vector<256x256xf32>
    %cst_24 = arith.constant dense<0.000000e+00> : vector<2x256xf32>
    %35 = tpu.matmul %32, %34, %cst_24 {dimension_numbers = #tpu.dot_dimension_numbers<[1], [0], [0], [1], [0, 0, 1, 1], [], []>} : vector<2x256xf32>, vector<256x256xf32>, vector<2x256xf32> -> vector<2x256xf32>
    %c0_25 = arith.constant 0 : index
    %c0_26 = arith.constant 0 : index
    %36 = vector.load %arg7[%c0_25, %c0_26] : memref<256x256xf32, #tpu.memory_space<vmem>>, vector<256x256xf32>
    %cst_27 = arith.constant dense<0.000000e+00> : vector<2x256xf32>
    %37 = tpu.matmul %33, %36, %cst_27 {dimension_numbers = #tpu.dot_dimension_numbers<[1], [0], [0], [1], [0, 0, 1, 1], [], []>} : vector<2x256xf32>, vector<256x256xf32>, vector<2x256xf32> -> vector<2x256xf32>
    %38 = arith.addf %35, %37 : vector<2x256xf32>
    %c0_28 = arith.constant 0 : index
    %39 = memref.load %arg8[%c0_28] : memref<1xf32, #tpu.memory_space<smem>>
    %40 = vector.broadcast %39 : f32 to vector<2x256xf32>
    %41 = arith.addf %38, %40 : vector<2x256xf32>
    %cst_29 = arith.constant 0.000000e+00 : f32
    %42 = vector.broadcast %cst_29 : f32 to vector<2x256xf32>
    %43 = arith.maximumf %41, %42 : vector<2x256xf32>
    %44 = vector.shape_cast %43 : vector<2x256xf32> to vector<2x1x256xf32>
    %45 = vector.broadcast %44 : vector<2x1x256xf32> to vector<2x32x256xf32>
    %46 = arith.mulf %29, %45 : vector<2x32x256xf32>
    %c0_30 = arith.constant 0 : index
    %c0_31 = arith.constant 0 : index
    %c0_32 = arith.constant 0 : index
    %47 = vector.load %arg9[%c0_30, %c0_31, %c0_32] : memref<2x32x256xf32, #tpu.memory_space<vmem>>, vector<2x32x256xf32>
    tpu.vector_store %arg9[%c0_30, %c0_31, %c0_32], %46 {strides = array<i32>} : memref<2x32x256xf32, #tpu.memory_space<vmem>>, vector<2x32x256xf32>,
    return
  }
  func.func @transform_0(%arg0: i32) -> (i32, i32, i32) {
    %c0_i32 = arith.constant 0 : i32
    %c0_i32_0 = arith.constant 0 : i32
    %c0_i32_1 = arith.constant 0 : i32
    return %arg0, %c0_i32, %c0_i32_0 : i32, i32, i32
  }
  func.func @transform_1(%arg0: i32) -> (i32, i32) {
    %c0_i32 = arith.constant 0 : i32
    %c0_i32_0 = arith.constant 0 : i32
    %c0_i32_1 = arith.constant 0 : i32
    return %c0_i32, %c0_i32_0 : i32, i32
  }
  func.func @transform_2(%arg0: i32) -> (i32, i32) {
    %c0_i32 = arith.constant 0 : i32
    %c0_i32_0 = arith.constant 0 : i32
    %c0_i32_1 = arith.constant 0 : i32
    return %c0_i32, %c0_i32_0 : i32, i32
  }
  func.func @transform_3(%arg0: i32) -> (i32, i32) {
    %c0_i32 = arith.constant 0 : i32
    %c0_i32_0 = arith.constant 0 : i32
    %c0_i32_1 = arith.constant 0 : i32
    return %c0_i32, %c0_i32_0 : i32, i32
  }
  func.func @transform_4(%arg0: i32) -> (i32, i32) {
    %c0_i32 = arith.constant 0 : i32
    %c0_i32_0 = arith.constant 0 : i32
    %c0_i32_1 = arith.constant 0 : i32
    return %c0_i32, %c0_i32_0 : i32, i32
  }
  func.func @transform_5(%arg0: i32) -> (i32, i32) {
    %c0_i32 = arith.constant 0 : i32
    %c0_i32_0 = arith.constant 0 : i32
    %c0_i32_1 = arith.constant 0 : i32
    return %c0_i32, %c0_i32_0 : i32, i32
  }
  func.func @transform_6(%arg0: i32) -> (i32, i32) {
    %c0_i32 = arith.constant 0 : i32
    %c0_i32_0 = arith.constant 0 : i32
    %c0_i32_1 = arith.constant 0 : i32
    return %c0_i32, %c0_i32_0 : i32, i32
  }
  func.func @transform_7(%arg0: i32) -> i32 {
    %c0_i32 = arith.constant 0 : i32
    %c0_i32_0 = arith.constant 0 : i32
    return %c0_i32 : i32
  }
  func.func @transform_8(%arg0: i32) -> (i32, i32, i32) {
    %c0_i32 = arith.constant 0 : i32
    %c0_i32_0 = arith.constant 0 : i32
    %c0_i32_1 = arith.constant 0 : i32
    return %arg0, %c0_i32, %c0_i32_0 : i32, i32, i32
  }
}

</mosaic_0001>

<bundles_post_ra>
// kernel: cbam_pallas.1
= control target key start
LH: loop header
LB: loop body
LE: loop exit
PB: predicated region body
PF: predicated region fallthrough
CT: control target
= control target key end

     0   :  { %s1564_s29 = smov 0   ;;  %s2220_s0 = inlined_call_operand.vmem [shape: f32[4,32,256], index: 0, kind: input, shape index: {}]   ;;  %s2221_s1 = inlined_call_operand.vmem [shape: f32[32,8], index: 1, kind: input, shape index: {}]   ;;  %s2222_s2 = inlined_call_operand.vmem [shape: f32[1,8], index: 2, kind: input, shape index: {}]   ;;  %s2223_s3 = inlined_call_operand.vmem [shape: f32[8,32], index: 3, kind: input, shape index: {}]   ;;  %s2224_s4 = inlined_call_operand.vmem [shape: f32[1,32], index: 4, kind: input, shape index: {}]   ;;  %s2225_s5 = inlined_call_operand.vmem [shape: f32[256,256], index: 5, kind: input, shape index: {}]   ;;  %s2226_s6 = inlined_call_operand.vmem [shape: f32[256,256], index: 6, kind: input, shape index: {}]   ;;  %s2227_s7 = inlined_call_operand.<no memory space> [shape: f32[1], index: 7, kind: input, shape index: {}]   ;;  %s2228_s8 = inlined_call_operand.vmem [shape: f32[4,32,256], index: 8, kind: output, shape index: {}]  }
   0x1   :  { %13 = sst [smem:[#allocation2]] %s2227_s7 }
   0x2 LB: > { %s1292_s30 = sadd.s32 4294967295, %s1510_s29   ;;  %p1296_p0 = scmp.ge.s32.totalorder %s1510_s29, 1  ;;  %s1510_s29 = sphi %s1564_s29, %s19_s29  }
   0x3   : > { %p265_p1 = scmp.lt.s32.totalorder %s1510_s29, 3 }
   0x5   : > { %p266_p2 = pnand %p1296_p0, %p265_p1 }
   0x6   : > { %s1297_s9 = sshll.u32 (!%p266_p2), %s1292_s30, 1  ;;  %v388_v30 = vld [vmem:[%s2221_s1] sm:$0xff] (!%p266_p2)  ;;  %v389_v31 = vld [vmem:[%s2221_s1 + $0x8] sm:$0xff] (!%p266_p2)  ;;  %v1512_v35 = vmov (!%p266_p2), 0.0|0.0   ;;  %v390_v36 = vld [vmem:[%s2221_s1 + $0x10] sm:$0xff] (!%p266_p2)  ;;  %vm1513_vm0 = vmmov (!%p266_p2), 0   ;;  %v407_v40 = vlaneseq (!%p266_p2) }
   0x7   : > { %269 = sbr.rel (%p266_p2) target bundleno = 1020 (0x3fc), region = 52  ;;  %p302_p3 = scmp.lt.s32.totalorder (!%p266_p2), %s1297_s9, 3  ;;  %v1351_v33 = vpack.c.bf16 (!%p266_p2), %v389_v31, %v388_v30  ;;  %1350 = vmatprep.subr.bf16.mxu0 (!%p266_p2), %v1512_v35  ;;  %1356 = vmatprep.subr.bf16.mxu1 (!%p266_p2), %v1512_v35  ;;  %v391_v37 = vld [vmem:[%s2221_s1 + $0x18] sm:$0xff] (!%p266_p2)  ;;  %v1514_v39 = vmov (!%p266_p2), 0.0   ;;  %vm418_vm1 = vcmask (!%p266_p2), 130112   ;;  %vm425_vm2 = vcmask (!%p266_p2), 195712  }
   0x8   : > { %v1354_v38 = vpack.c.bf16 (!%p266_p2), %v391_v37, %v390_v36  ;;  %1331 = vmatprep.mubr.msk.f32.mxu0 (!%p266_p2), %vm1513_vm0, %v1514_v39  ;;  %1342 = vmatprep.mubr.msk.f32.mxu1 (!%p266_p2), %vm1513_vm0, %v1514_v39  ;;  %v408_v42 = vand.u32 (!%p266_p2), 127, %v407_v40  ;;  %v1658_v47 = vshrl.u32 (!%p266_p2), %v407_v40, 7  ;;  %vm432_vm3 = vcmask (!%p266_p2), 261312   ;;  %s1151_s23 = sld [smem:[#allocation2]] (!%p266_p2) }
   0x9   : > { %1352 = vmatpush3.bf16.msra.mxu0 (!%p266_p2), %v1351_v33  ;;  %1358 = vmatpush3.bf16.msra.mxu1 (!%p266_p2), %v1351_v33  ;;  %vm453_vm4 = vcmask (!%p266_p2), 1041409   ;;  %vm455_vm5 = vcmask (!%p266_p2), 261120   ;;  %vm659_vm6 = vcmask (!%p266_p2), 64512  }
   0xa   : > { %1353 = vmatprep.subr.bf16.mxu0 (!%p266_p2), %v1512_v35  ;;  %1359 = vmatprep.subr.bf16.mxu1 (!%p266_p2), %v1512_v35  ;;  %v413_v44 = vadd.s32 (!%p266_p2), 4294967288, %v408_v42  ;;  %v420_v46 = vadd.s32 (!%p266_p2), 4294967280, %v408_v42  ;;  %v427_v51 = vadd.s32 (!%p266_p2), 4294967272, %v408_v42  ;;  %v411_v55 = vsub.s32 (!%p266_p2), %v408_v42, %v1658_v47 }
   0xc   : > { %v416_v49 = vsub.s32 (!%p266_p2), %v413_v44, %v1658_v47  ;;  %v423_v53 = vsub.s32 (!%p266_p2), %v420_v46, %v1658_v47  ;;  %v430_v62 = vsub.s32 (!%p266_p2), %v427_v51, %v1658_v47 }
   0xd   : > { %1355 = vmatpush3.bf16.msra.mxu0 (!%p266_p2), %v1354_v38  ;;  %1361 = vmatpush3.bf16.msra.mxu1 (!%p266_p2), %v1354_v38 }
   0xe   : > { %s2230_s9 = smov (!%p302_p3, %s1297_s9), 3  ;;  %1345 = vmatprep.subr.mxu0 %v1514_v39 }
   0xf   : > { %s1309_s7 = sshll.u32 %s2230_s9, 6 }
  0x10   : > { %s306_s12 = scalar_lea.vmem %s2220_s0, %s1309_s7  ;;  %s2181_s26 = scalar_lea.vmem %s2228_s8, %s1309_s7 }
  0x11   : > { %v1580_v0 = vld [vmem:[%s306_s12 + $0x40] sm:$0xff]  ;;  %v1582_v1 = vld [vmem:[%s306_s12 + $0x48] sm:$0xff]  ;;  %v1590_v5 = vld [vmem:[%s306_s12 + $0x50] sm:$0xff] }
  0x12   : > { %v1584_v2 = vld [vmem:[%s306_s12] sm:$0xff]  ;;  %v343_v3 = vadd.f32 %v1582_v1, %v1580_v0  ;;  %v1588_v4 = vld [vmem:[%s306_s12 + $0x8] sm:$0xff]  ;;  %v1592_v6 = vld [vmem:[%s306_s12 + $0x58] sm:$0xff]  ;;  %v376_v27 = vmax.f32 %v1580_v0, %v1582_v1 }
  0x13   : > { %v331_v7 = vadd.f32 %v1588_v4, %v1584_v2  ;;  %v1596_v8 = vld [vmem:[%s306_s12 + $0x10] sm:$0xff]  ;;  %v1598_v9 = vld [vmem:[%s306_s12 + $0x18] sm:$0xff]  ;;  %v346_v10 = vadd.f32 %v1592_v6, %v1590_v5  ;;  %v1604_v12 = vld [vmem:[%s306_s12 + $0x60] sm:$0xff]  ;;  %v364_v25 = vmax.f32 %v1584_v2, %v1588_v4  ;;  %v379_v26 = vmax.f32 %v1590_v5, %v1592_v6 }
  0x14   : > { %344 = vadd.xlane.f32.xlu1 %v343_v3  ;;  %v334_v11 = vadd.f32 %v1598_v9, %v1596_v8  ;;  %v1606_v13 = vld [vmem:[%s306_s12 + $0x68] sm:$0xff]  ;;  %v1608_v14 = vld [vmem:[%s306_s12 + $0x20] sm:$0xff]  ;;  %v1616_v18 = vld [vmem:[%s306_s12 + $0x70] sm:$0xff]  ;;  %v367_v24 = vmax.f32 %v1596_v8, %v1598_v9 }
  0x15   : > { %332 = vadd.xlane.f32.xlu0 %v331_v7  ;;  %v1610_v15 = vld [vmem:[%s306_s12 + $0x28] sm:$0xff]  ;;  %v349_v16 = vadd.f32 %v1606_v13, %v1604_v12  ;;  %v1618_v19 = vld [vmem:[%s306_s12 + $0x78] sm:$0xff]  ;;  %v1620_v20 = vld [vmem:[%s306_s12 + $0x30] sm:$0xff]  ;;  %v382_v28 = vmax.f32 %v1604_v12, %v1606_v13 }
  0x16   : > { %v337_v17 = vadd.f32 %v1610_v15, %v1608_v14  ;;  %v1622_v21 = vld [vmem:[%s306_s12 + $0x38] sm:$0xff]  ;;  %v352_v22 = vadd.f32 %v1618_v19, %v1616_v18  ;;  %v370_v29 = vmax.f32 %v1608_v14, %v1610_v15  ;;  %v385_v32 = vmax.f32 %v1616_v18, %v1618_v19 }
  0x17   : > { %v340_v23 = vadd.f32 %v1622_v21, %v1620_v20  ;;  %v373_v34 = vmax.f32 %v1620_v20, %v1622_v21 }
  0x18   : > { %347 = vadd.xlane.f32.xlu1 %v346_v10 }
  0x19   : > { %335 = vadd.xlane.f32.xlu0 %v334_v11 }
  0x1c   : > { %350 = vadd.xlane.f32.xlu1 %v349_v16 }
  0x1d   : > { %338 = vadd.xlane.f32.xlu0 %v337_v17 }
  0x20   : > { %353 = vadd.xlane.f32.xlu1 %v352_v22 }
  0x21   : > { %341 = vadd.xlane.f32.xlu0 %v340_v23 }
  0x24   : > { %368 = vmax.xlane.f32.xlu1 %v367_v24 }
  0x25   : > { %365 = vmax.xlane.f32.xlu0 %v364_v25 }
  0x28   : > { %380 = vmax.xlane.f32.xlu1 %v379_v26 }
  0x29   : > { %377 = vmax.xlane.f32.xlu0 %v376_v27 }
  0x2c   : > { %383 = vmax.xlane.f32.xlu1 %v382_v28 }
  0x2d   : > { %371 = vmax.xlane.f32.xlu0 %v370_v29 }
  0x30   : > { %386 = vmax.xlane.f32.xlu1 %v385_v32 }
  0x31   : > { %374 = vmax.xlane.f32.xlu0 %v373_v34 }
  0xa1   : > { %v345_v41 = vpop.xlane.xlu1 %344 }
  0xa2   : > { %v333_v43 = vpop.xlane.xlu0 %332  ;;  %v360_v56 = vmul.f32 0.00390625, %v345_v41 }
  0xa3   : > { %v356_v59 = vmul.f32 0.00390625, %v333_v43 }
  0xa4   : > { %v437_v10 = vrot.slane %v360_v56, %v411_v55 }
  0xa5   : > { %v348_v45 = vpop.xlane.xlu1 %347  ;;  %v412_v22 = vrot.slane %v356_v59, %v411_v55 }
  0xa6   : > { %v336_v48 = vpop.xlane.xlu0 %335  ;;  %v361_v50 = vmul.f32 0.00390625, %v348_v45 }
  0xa7   : > { %v357_v52 = vmul.f32 0.00390625, %v336_v48 }
  0xa8   : > { %v441_v61 = vrot.slane %v361_v50, %v416_v49 }
  0xa9   : > { %v351_v54 = vpop.xlane.xlu1 %350  ;;  %v417_v63 = vrot.slane %v357_v52, %v416_v49 }
  0xaa   : > { %v362_v57 = vmul.f32 0.00390625, %v351_v54  ;;  %v339_v58 = vpop.xlane.xlu0 %338  ;;  %v442_v24 = vsel %vm418_vm1, %v441_v61, %v437_v10 }
  0xab   : > { %v358_v60 = vmul.f32 0.00390625, %v339_v58  ;;  %v419_v26 = vsel %vm418_vm1, %v417_v63, %v412_v22  ;;  %v929_v22 = vld [vmem:[%s2226_s6] sm:$0xff] }
  0xac   : > { %v446_v3 = vrot.slane %v362_v57, %v423_v53 }
  0xad   : > { %v354_v7 = vpop.xlane.xlu1 %353  ;;  %v424_v11 = vrot.slane %v358_v60, %v423_v53  ;;  %v1303_v60 = vld [vmem:[%s2222_s2] ss:$0 sm:$0xff] }
  0xae   : > { %v363_v16 = vmul.f32 0.00390625, %v354_v7  ;;  %v342_v17 = vpop.xlane.xlu0 %341  ;;  %v447_v27 = vsel %vm425_vm2, %v446_v3, %v442_v24  ;;  %v931_v24 = vld [vmem:[%s2226_s6 + $0x10] sm:$0xff] }
  0xaf   : > { %v359_v23 = vmul.f32 0.00390625, %v342_v17  ;;  %v426_v30 = vsel %vm425_vm2, %v424_v11, %v419_v26  ;;  %v932_v17 = vld [vmem:[%s2226_s6 + $0x18] sm:$0xff] }
  0xb0   : > { %v451_v25 = vrot.slane %v363_v16, %v430_v62  ;;  %v930_v16 = vld [vmem:[%s2226_s6 + $0x8] sm:$0xff]  ;;  %v868_v26 = vld [vmem:[%s2225_s5 + $0x18] sm:$0xff] }
  0xb1   : > { %v431_v28 = vrot.slane %v359_v23, %v430_v62  ;;  %v369_v29 = vpop.xlane.xlu1 %368  ;;  %v1362_v23 = vpack.c.bf16 %v932_v17, %v930_v16  ;;  %v948_v16 = vld [vmem:[%s2226_s6 + $0x98] sm:$0xff] }
  0xb2   : > { %v366_v31 = vpop.xlane.xlu0 %365  ;;  %v452_v32 = vsel %vm432_vm3, %v451_v25, %v447_v27  ;;  %v544_v42 = vrot.slane %v369_v29, %v416_v49  ;;  %v866_v25 = vld [vmem:[%s2225_s5 + $0x8] sm:$0xff]  ;;  %v1364_v27 = vpack.c.bf16 %v931_v24, %v929_v22  ;;  %v865_v29 = vld [vmem:[%s2225_s5] sm:$0xff] }
  0xb3   : > { %v433_v33 = vsel %vm432_vm3, %v431_v28, %v426_v30  ;;  %v540_v43 = vrot.slane %v366_v31, %v411_v55  ;;  %v1426_v28 = vpack.c.bf16 %v868_v26, %v866_v25  ;;  %v867_v30 = vld [vmem:[%s2225_s5 + $0x10] sm:$0xff]  ;;  %v934_v31 = vld [vmem:[%s2226_s6 + $0x28] sm:$0xff]  ;;  %v945_v26 = vld [vmem:[%s2226_s6 + $0x80] sm:$0xff] }
  0xb4   : > { %v454_v34 = vsel %vm453_vm4, %v452_v32, %v433_v33  ;;  %v1428_v32 = vpack.c.bf16 %v867_v30, %v865_v29  ;;  %v936_v33 = vld [vmem:[%s2226_s6 + $0x38] sm:$0xff]  ;;  %v882_v22 = vld [vmem:[%s2225_s5 + $0x88] sm:$0xff]  ;;  %v883_v30 = vld [vmem:[%s2225_s5 + $0x90] sm:$0xff] }
  0xb5   : > { %1332 = vmatmul.mubr.msk.f32.vlgmr.msra.gmra.mrb[0].mxu0 %vm455_vm5, %v454_v34  ;;  %v381_v35 = vpop.xlane.xlu1 %380  ;;  %v545_v52 = vsel %vm418_vm1, %v544_v42, %v540_v43  ;;  %v933_v34 = vld [vmem:[%s2226_s6 + $0x20] sm:$0xff]  ;;  %1427 = vmatprep.subr.bf16.mxu1 %v1426_v28  ;;  %v871_v43 = vld [vmem:[%s2225_s5 + $0x30] sm:$0xff] }
  0xb6   : > { %v378_v36 = vpop.xlane.xlu0 %377  ;;  %1347 = vmatprep.mubr.msk.f32.mxu0 %vm1513_vm0, %v1514_v39  ;;  %v563_v38 = vrot.slane %v381_v35, %v416_v49  ;;  %v935_v35 = vld [vmem:[%s2226_s6 + $0x30] sm:$0xff]  ;;  %v881_v28 = vld [vmem:[%s2225_s5 + $0x80] sm:$0xff] }
  0xb7   : > { %v559_v40 = vrot.slane %v378_v36, %v411_v55  ;;  %v1366_v36 = vpack.c.bf16 %v936_v33, %v934_v31  ;;  %v950_v31 = vld [vmem:[%s2226_s6 + $0xa8] sm:$0xff] }
  0xb8   : > { %v886_v33 = vld [vmem:[%s2225_s5 + $0xa8] sm:$0xff] }
  0xb9   : > { %v384_v37 = vpop.xlane.xlu1 %383  ;;  %v564_v48 = vsel %vm418_vm1, %v563_v38, %v559_v40  ;;  %v870_v38 = vld [vmem:[%s2225_s5 + $0x28] sm:$0xff]  ;;  %v872_v40 = vld [vmem:[%s2225_s5 + $0x38] sm:$0xff] }
  0xba   : > { %v372_v41 = vpop.xlane.xlu0 %371  ;;  %v568_v44 = vrot.slane %v384_v37, %v423_v53  ;;  %v1368_v37 = vpack.c.bf16 %v935_v35, %v933_v34  ;;  %v1430_v42 = vpack.c.bf16 %v872_v40, %v870_v38  ;;  %v888_v34 = vld [vmem:[%s2225_s5 + $0xb8] sm:$0xff]  ;;  %v949_v38 = vld [vmem:[%s2226_s6 + $0xa0] sm:$0xff]  ;;  %v951_v40 = vld [vmem:[%s2226_s6 + $0xb0] sm:$0xff] }
  0xbb   : > { %v549_v45 = vrot.slane %v372_v41, %v423_v53  ;;  %v650_v53 = vld [vmem:[%s2223_s3] sm:$0xff] }
  0xbc   : > { %v569_v54 = vsel %vm425_vm2, %v568_v44, %v564_v48  ;;  %1346 = vmatpush3.msra.mxu0 %v650_v53  ;;  %v869_v41 = vld [vmem:[%s2225_s5 + $0x20] sm:$0xff]  ;;  %v938_v44 = vld [vmem:[%s2226_s6 + $0x48] sm:$0xff]  ;;  %v944_v53 = vld [vmem:[%s2226_s6 + $0x78] sm:$0xff] }
  0xbd   : > { %v387_v46 = vpop.xlane.xlu1 %386  ;;  %v550_v39 = vsel %vm425_vm2, %v549_v45, %v545_v52  ;;  %1363 = vmatprep.subr.bf16.mxu0 %v1362_v23  ;;  %v940_v45 = vld [vmem:[%s2226_s6 + $0x58] sm:$0xff]  ;;  %v874_v52 = vld [vmem:[%s2225_s5 + $0x48] sm:$0xff] }
  0xbe   : > { %v573_v50 = vrot.slane %v387_v46, %v430_v62  ;;  %v375_v51 = vpop.xlane.xlu0 %374  ;;  %v1432_v46 = vpack.c.bf16 %v871_v43, %v869_v41  ;;  %v1370_v48 = vpack.c.bf16 %v940_v45, %v938_v44  ;;  %v884_v23 = vld [vmem:[%s2225_s5 + $0x98] sm:$0xff]  ;;  %v885_v41 = vld [vmem:[%s2225_s5 + $0xa0] sm:$0xff]  ;;  %v887_v43 = vld [vmem:[%s2225_s5 + $0xb0] sm:$0xff] }
  0xbf   : > { %v554_v56 = vrot.slane %v375_v51, %v430_v62  ;;  %v939_v51 = vld [vmem:[%s2226_s6 + $0x50] sm:$0xff]  ;;  %v1442_v29 = vpack.c.bf16 %v884_v23, %v882_v22  ;;  %v954_v44 = vld [vmem:[%s2226_s6 + $0xc8] sm:$0xff]  ;;  %v956_v45 = vld [vmem:[%s2226_s6 + $0xd8] sm:$0xff]  ;;  %v1883_v23 = vsub.s32 0, %v1658_v47 }
  0xc0   : > { %v574_v57 = vsel %vm432_vm3, %v573_v50, %v569_v54  ;;  %v937_v50 = vld [vmem:[%s2226_s6 + $0x40] sm:$0xff]  ;;  %v876_v54 = vld [vmem:[%s2225_s5 + $0x58] sm:$0xff] }
  0xc1   : > { %v555_v58 = vsel %vm432_vm3, %v554_v56, %v550_v39  ;;  %v873_v56 = vld [vmem:[%s2225_s5 + $0x40] sm:$0xff]  ;;  %v875_v39 = vld [vmem:[%s2225_s5 + $0x50] sm:$0xff] }
  0xc2   : > { %v575_v49 = vsel %vm453_vm4, %v574_v57, %v555_v58  ;;  %v1372_v57 = vpack.c.bf16 %v939_v51, %v937_v50  ;;  %v1434_v58 = vpack.c.bf16 %v876_v54, %v874_v52  ;;  %v1384_v50 = vpack.c.bf16 %v951_v40, %v949_v38  ;;  %v953_v54 = vld [vmem:[%s2226_s6 + $0xc0] sm:$0xff]  ;;  %v966_v38 = vld [vmem:[%s2226_s6 + $0x128] sm:$0xff]  ;;  %v968_v40 = vld [vmem:[%s2226_s6 + $0x138] sm:$0xff] }
  0xc3   : > { %1343 = vmatmul.mubr.msk.f32.vlgmr.msra.gmra.mrb[0].mxu1 %vm455_vm5, %v575_v49  ;;  %v942_v49 = vld [vmem:[%s2226_s6 + $0x68] sm:$0xff]  ;;  %v1448_v51 = vpack.c.bf16 %v887_v43, %v885_v41  ;;  %v1386_v52 = vpack.c.bf16 %v956_v45, %v954_v44  ;;  %v1398_v41 = vpack.c.bf16 %v968_v40, %v966_v38  ;;  %v967_v43 = vld [vmem:[%s2226_s6 + $0x130] sm:$0xff]  ;;  %v977_v38 = vld [vmem:[%s2226_s6 + $0x180] sm:$0xff] }
  0xc4   : > { %1429 = vmatpush1.bf16.msra.mxu1 %v1428_v32  ;;  %v952_v32 = vld [vmem:[%s2226_s6 + $0xb8] sm:$0xff]  ;;  %v979_v40 = vld [vmem:[%s2226_s6 + $0x190] sm:$0xff] }
  0xc5   : > { %1431 = vmatprep.subr.bf16.mxu1 %v1430_v42  ;;  %v1446_v42 = vpack.c.bf16 %v888_v34, %v886_v33  ;;  %v897_v34 = vld [vmem:[%s2225_s5 + $0x100] sm:$0xff] }
  0xc8   : > { %1433 = vmatpush1.bf16.msra.mxu1 %v1432_v46  ;;  %v890_v46 = vld [vmem:[%s2225_s5 + $0xc8] sm:$0xff] }
  0xc9   : > { %1435 = vmatprep.subr.bf16.mxu1 %v1434_v58  ;;  %v891_v58 = vld [vmem:[%s2225_s5 + $0xd0] sm:$0xff] }
 0x188   : > { %v524_v55 = vpop.f32.mrb[0].mxu0 }
 0x189   : > { %v1333_v59 = vpop.f32.mrb[1].mxu0  ;;  %v525_v61 = vadd.f32 %v1303_v60, %v524_v55  ;;  %v941_v55 = vld [vmem:[%s2226_s6 + $0x60] sm:$0xff] }
 0x18a   : > { %v1436_v59 = vpack.c.bf16 %v875_v39, %v873_v56  ;;  %v955_v56 = vld [vmem:[%s2226_s6 + $0xd0] sm:$0xff]  ;;  %v889_v39 = vld [vmem:[%s2225_s5 + $0xc0] sm:$0xff] }
 0x18b   : > { %v528_v7 = vmax.f32 %v525_v61, 0.0  ;;  %v943_v61 = vld [vmem:[%s2226_s6 + $0x70] sm:$0xff] }
 0x18c   : > { %v1376_v17 = vpack.c.bf16 %v943_v61, %v941_v55  ;;  %1437 = vmatpush1.bf16.msra.mxu1 %v1436_v59  ;;  %v1388_v55 = vpack.c.bf16 %v955_v56, %v953_v54  ;;  %v1452_v59 = vpack.c.bf16 %v891_v58, %v889_v39  ;;  %v957_v61 = vld [vmem:[%s2226_s6 + $0xe0] sm:$0xff]  ;;  %v903_v56 = vld [vmem:[%s2225_s5 + $0x130] sm:$0xff]  ;;  %v972_v58 = vld [vmem:[%s2226_s6 + $0x158] sm:$0xff] }
 0x18d   : > { %v901_v54 = vld [vmem:[%s2225_s5 + $0x120] sm:$0xff] }
 0x18e   : > { %v1464_v39 = vpack.c.bf16 %v903_v56, %v901_v54  ;;  %v981_v54 = vld [vmem:[%s2226_s6 + $0x1a0] sm:$0xff]  ;;  %v983_v56 = vld [vmem:[%s2226_s6 + $0x1b0] sm:$0xff] }
 0x196   : > { %v644_v62 = vpop.f32.mrb[0].mxu1 }
 0x197   : > { %v645_v63 = vadd.f32 %v1303_v60, %v644_v62  ;;  %v1344_v3 = vpop.f32.mrb[1].mxu1  ;;  %v1374_v60 = vpack.c.bf16 %v944_v53, %v942_v49  ;;  %v878_v62 = vld [vmem:[%s2225_s5 + $0x68] sm:$0xff]  ;;  %v960_v53 = vld [vmem:[%s2226_s6 + $0xf8] sm:$0xff] }
 0x198   : > { %v958_v49 = vld [vmem:[%s2226_s6 + $0xe8] sm:$0xff] }
 0x199   : > { %v648_v10 = vmax.f32 %v645_v63, 0.0  ;;  %v880_v63 = vld [vmem:[%s2225_s5 + $0x78] sm:$0xff] }
 0x19a   : > { %v1438_v3 = vpack.c.bf16 %v880_v63, %v878_v62  ;;  %v959_v62 = vld [vmem:[%s2226_s6 + $0xf0] sm:$0xff] }
 0x19b   : > { %v649_v11 = vadd.f32 %v648_v10, %v528_v7  ;;  %v877_v7 = vld [vmem:[%s2225_s5 + $0x60] sm:$0xff]  ;;  %v879_v10 = vld [vmem:[%s2225_s5 + $0x70] sm:$0xff]  ;;  %v1392_v63 = vpack.c.bf16 %v959_v62, %v957_v61  ;;  %v906_v61 = vld [vmem:[%s2225_s5 + $0x148] sm:$0xff] }
 0x19c   : > { %v1440_v24 = vpack.c.bf16 %v879_v10, %v877_v7  ;;  %1439 = vmatprep.subr.bf16.mxu1 %v1438_v3  ;;  %v651_v3 = vld [vmem:[%s2224_s4] sm:$0x1]  ;;  %v894_v7 = vld [vmem:[%s2225_s5 + $0xe8] sm:$0xff]  ;;  %v896_v10 = vld [vmem:[%s2225_s5 + $0xf8] sm:$0xff] }
 0x19d   : > { %1348 = vmatmul.mubr.msk.f32.vlgmr.msra.gmra.mrb[2].mxu0 %vm659_vm6, %v649_v11  ;;  %v946_v11 = vld [vmem:[%s2226_s6 + $0x88] sm:$0xff]  ;;  %v652_v22 = vmul.f32 2.0, %v651_v3  ;;  %v908_v62 = vld [vmem:[%s2225_s5 + $0x158] sm:$0xff]  ;;  %v1954_v3 = vsub.s32 1, %v1658_v47 }
 0x19e   : > { %1365 = vmatpush1.bf16.msra.mxu0 %v1364_v27  ;;  %v1378_v25 = vpack.c.bf16 %v948_v16, %v946_v11  ;;  %v947_v27 = vld [vmem:[%s2226_s6 + $0x90] sm:$0xff]  ;;  %1441 = vmatpush1.bf16.msra.mxu1 %v1440_v24  ;;  %v1454_v11 = vpack.c.bf16 %v896_v10, %v894_v7  ;;  %v893_v16 = vld [vmem:[%s2225_s5 + $0xe0] sm:$0xff]  ;;  %v1466_v7 = vpack.c.bf16 %v908_v62, %v906_v61  ;;  %v988_v61 = vld [vmem:[%s2226_s6 + $0x1d8] sm:$0xff] }
 0x19f   : > { %1367 = vmatprep.subr.bf16.mxu0 %v1366_v36  ;;  %v1380_v35 = vpack.c.bf16 %v947_v27, %v945_v26  ;;  %v1444_v36 = vpack.c.bf16 %v883_v30, %v881_v28  ;;  %1443 = vmatprep.subr.bf16.mxu1 %v1442_v29  ;;  %v964_v26 = vld [vmem:[%s2226_s6 + $0x118] sm:$0xff]  ;;  %v961_v28 = vld [vmem:[%s2226_s6 + $0x100] sm:$0xff]  ;;  %v963_v29 = vld [vmem:[%s2226_s6 + $0x110] sm:$0xff] }
 0x1a0   : > { %v1396_v30 = vpack.c.bf16 %v963_v29, %v961_v28  ;;  %v905_v10 = vld [vmem:[%s2225_s5 + $0x140] sm:$0xff]  ;;  %v910_v28 = vld [vmem:[%s2225_s5 + $0x168] sm:$0xff]  ;;  %v912_v29 = vld [vmem:[%s2225_s5 + $0x178] sm:$0xff] }
 0x1a2   : > { %1369 = vmatpush1.bf16.msra.mxu0 %v1368_v37  ;;  %v1382_v37 = vpack.c.bf16 %v952_v32, %v950_v31  ;;  %1445 = vmatpush1.bf16.msra.mxu1 %v1444_v36  ;;  %v898_v31 = vld [vmem:[%s2225_s5 + $0x108] sm:$0xff]  ;;  %v900_v32 = vld [vmem:[%s2225_s5 + $0x118] sm:$0xff]  ;;  %v657_v36 = vrot.slane %v652_v22, %v1883_v23 }
 0x1a3   : > { %1371 = vmatprep.subr.bf16.mxu0 %v1370_v48  ;;  %v892_v48 = vld [vmem:[%s2225_s5 + $0xd8] sm:$0xff]  ;;  %1447 = vmatprep.subr.bf16.mxu1 %v1446_v42  ;;  %v1458_v33 = vpack.c.bf16 %v900_v32, %v898_v31  ;;  %v965_v42 = vld [vmem:[%s2226_s6 + $0x120] sm:$0xff]  ;;  %v1470_v31 = vpack.c.bf16 %v912_v29, %v910_v28 }
 0x1a4   : > { %v1400_v44 = vpack.c.bf16 %v967_v43, %v965_v42  ;;  %v976_v22 = vld [vmem:[%s2226_s6 + $0x178] sm:$0xff]  ;;  %v909_v32 = vld [vmem:[%s2225_s5 + $0x160] sm:$0xff]  ;;  %v914_v42 = vld [vmem:[%s2225_s5 + $0x188] sm:$0xff] }
 0x1a5   : > { %v916_v43 = vld [vmem:[%s2225_s5 + $0x198] sm:$0xff]  ;;  %v989_v29 = vld [vmem:[%s2226_s6 + $0x1e0] sm:$0xff] }
 0x1a6   : > { %1373 = vmatpush1.bf16.msra.mxu0 %v1372_v57  ;;  %v1450_v57 = vpack.c.bf16 %v892_v48, %v890_v46  ;;  %1449 = vmatpush1.bf16.msra.mxu1 %v1448_v51  ;;  %v902_v46 = vld [vmem:[%s2225_s5 + $0x128] sm:$0xff]  ;;  %v904_v48 = vld [vmem:[%s2225_s5 + $0x138] sm:$0xff] }
 0x1a7   : > { %1375 = vmatprep.subr.bf16.mxu0 %v1374_v60  ;;  %v1390_v60 = vpack.c.bf16 %v960_v53, %v958_v49 }
 0x1a8   : > { %1451 = vmatprep.subr.bf16.mxu1 %v1450_v57  ;;  %v970_v57 = vld [vmem:[%s2226_s6 + $0x148] sm:$0xff] }
 0x1a9   : > { %v1402_v53 = vpack.c.bf16 %v972_v58, %v970_v57  ;;  %v918_v57 = vld [vmem:[%s2225_s5 + $0x1a8] sm:$0xff]  ;;  %v920_v58 = vld [vmem:[%s2225_s5 + $0x1b8] sm:$0xff] }
 0x1aa   : > { %1377 = vmatpush1.bf16.msra.mxu0 %v1376_v17  ;;  %1453 = vmatpush1.bf16.msra.mxu1 %v1452_v59  ;;  %v895_v17 = vld [vmem:[%s2225_s5 + $0xf0] sm:$0xff] }
 0x1ab   : > { %1379 = vmatprep.subr.bf16.mxu0 %v1378_v25  ;;  %v1456_v24 = vpack.c.bf16 %v895_v17, %v893_v16  ;;  %v962_v25 = vld [vmem:[%s2226_s6 + $0x108] sm:$0xff]  ;;  %1455 = vmatprep.subr.bf16.mxu1 %v1454_v11  ;;  %v971_v59 = vld [vmem:[%s2226_s6 + $0x150] sm:$0xff] }
 0x1ac   : > { %v1394_v27 = vpack.c.bf16 %v964_v26, %v962_v25  ;;  %v907_v11 = vld [vmem:[%s2225_s5 + $0x150] sm:$0xff]  ;;  %v974_v17 = vld [vmem:[%s2226_s6 + $0x168] sm:$0xff]  ;;  %v973_v25 = vld [vmem:[%s2226_s6 + $0x160] sm:$0xff] }
 0x1ad   : > { %v1468_v16 = vpack.c.bf16 %v907_v11, %v905_v10  ;;  %v975_v26 = vld [vmem:[%s2226_s6 + $0x170] sm:$0xff]  ;;  %v922_v11 = vld [vmem:[%s2225_s5 + $0x1c8] sm:$0xff] }
 0x1ae   : > { %1381 = vmatpush1.bf16.msra.mxu0 %v1380_v35  ;;  %1457 = vmatpush1.bf16.msra.mxu1 %v1456_v24  ;;  %v899_v35 = vld [vmem:[%s2225_s5 + $0x110] sm:$0xff]  ;;  %v1406_v24 = vpack.c.bf16 %v976_v22, %v974_v17  ;;  %v921_v17 = vld [vmem:[%s2225_s5 + $0x1c0] sm:$0xff] }
 0x1af   : > { %1383 = vmatprep.subr.bf16.mxu0 %v1382_v37  ;;  %v1460_v37 = vpack.c.bf16 %v899_v35, %v897_v34  ;;  %1459 = vmatprep.subr.bf16.mxu1 %v1458_v33  ;;  %v911_v33 = vld [vmem:[%s2225_s5 + $0x170] sm:$0xff]  ;;  %v978_v35 = vld [vmem:[%s2226_s6 + $0x188] sm:$0xff] }
 0x1b0   : > { %v1472_v34 = vpack.c.bf16 %v911_v33, %v909_v32  ;;  %v926_v32 = vld [vmem:[%s2225_s5 + $0x1e8] sm:$0xff] }
 0x1b2   : > { %1385 = vmatpush1.bf16.msra.mxu0 %v1384_v50  ;;  %1461 = vmatpush1.bf16.msra.mxu1 %v1460_v37 }
 0x1b3   : > { %1387 = vmatprep.subr.bf16.mxu0 %v1386_v52  ;;  %v1462_v52 = vpack.c.bf16 %v904_v48, %v902_v46  ;;  %v915_v46 = vld [vmem:[%s2225_s5 + $0x190] sm:$0xff] }
 0x1b5   : > { %1463 = vmatprep.subr.bf16.mxu1 %v1462_v52 }
 0x1b6   : > { %1389 = vmatpush1.bf16.msra.mxu0 %v1388_v55  ;;  %v969_v55 = vld [vmem:[%s2226_s6 + $0x140] sm:$0xff]  ;;  %1465 = vmatpush1.bf16.msra.mxu1 %v1464_v39  ;;  %v1416_v39 = vpack.c.bf16 %v983_v56, %v981_v54 }
 0x1b7   : > { %1391 = vmatprep.subr.bf16.mxu0 %v1390_v60  ;;  %v1404_v60 = vpack.c.bf16 %v971_v59, %v969_v55  ;;  %1467 = vmatprep.subr.bf16.mxu1 %v1466_v7  ;;  %v919_v55 = vld [vmem:[%s2225_s5 + $0x1b0] sm:$0xff] }
 0x1b8   : > { %v987_v7 = vld [vmem:[%s2226_s6 + $0x1d0] sm:$0xff] }
 0x1ba   : > { %1393 = vmatpush1.bf16.msra.mxu0 %v1392_v63  ;;  %1469 = vmatpush1.bf16.msra.mxu1 %v1468_v16  ;;  %v924_v16 = vld [vmem:[%s2225_s5 + $0x1d8] sm:$0xff] }
 0x1bb   : > { %1395 = vmatprep.subr.bf16.mxu0 %v1394_v27  ;;  %v1408_v27 = vpack.c.bf16 %v975_v26, %v973_v25  ;;  %1471 = vmatprep.subr.bf16.mxu1 %v1470_v31  ;;  %v1482_v22 = vpack.c.bf16 %v924_v16, %v922_v11  ;;  %v990_v25 = vld [vmem:[%s2226_s6 + $0x1e8] sm:$0xff]  ;;  %v992_v26 = vld [vmem:[%s2226_s6 + $0x1f8] sm:$0xff]  ;;  %v991_v31 = vld [vmem:[%s2226_s6 + $0x1f0] sm:$0xff] }
 0x1bc   : > { %v1422_v28 = vpack.c.bf16 %v992_v26, %v990_v25  ;;  %v1424_v33 = vpack.c.bf16 %v991_v31, %v989_v29 }
 0x1be   : > { %1397 = vmatpush1.bf16.msra.mxu0 %v1396_v30  ;;  %1473 = vmatpush1.bf16.msra.mxu1 %v1472_v34  ;;  %v928_v34 = vld [vmem:[%s2225_s5 + $0x1f8] sm:$0xff] }
 0x1bf   : > { %1399 = vmatprep.subr.bf16.mxu0 %v1398_v41  ;;  %v1412_v41 = vpack.c.bf16 %v979_v40, %v977_v38 }
 0x1c2   : > { %1401 = vmatpush1.bf16.msra.mxu0 %v1400_v44  ;;  %v1474_v44 = vpack.c.bf16 %v916_v43, %v914_v42 }
 0x1c3   : > { %1403 = vmatprep.subr.bf16.mxu0 %v1402_v53  ;;  %v917_v53 = vld [vmem:[%s2225_s5 + $0x1a0] sm:$0xff] }
 0x1c4   : > { %1475 = vmatprep.subr.bf16.mxu1 %v1474_v44  ;;  %v1480_v59 = vpack.c.bf16 %v919_v55, %v917_v53 }
 0x1c6   : > { %1405 = vmatpush1.bf16.msra.mxu0 %v1404_v60  ;;  %v986_v60 = vld [vmem:[%s2226_s6 + $0x1c8] sm:$0xff] }
 0x1c7   : > { %1407 = vmatprep.subr.bf16.mxu0 %v1406_v24  ;;  %v1418_v62 = vpack.c.bf16 %v988_v61, %v986_v60  ;;  %v923_v24 = vld [vmem:[%s2225_s5 + $0x1d0] sm:$0xff] }
 0x1ca   : > { %1409 = vmatpush1.bf16.msra.mxu0 %v1408_v27  ;;  %v1484_v27 = vpack.c.bf16 %v923_v24, %v921_v17 }
 0x270   : > { %v729_v45 = vpop.f32.mrb[2].mxu0 }
 0x271   : > { %v730_v50 = vadd.f32 %v729_v45, %v657_v36  ;;  %v1349_v51 = vpop.f32.mrb[3].mxu0  ;;  %v980_v36 = vld [vmem:[%s2226_s6 + $0x198] sm:$0xff]  ;;  %v913_v45 = vld [vmem:[%s2225_s5 + $0x180] sm:$0xff] }
 0x272   : > { %v1410_v37 = vpack.c.bf16 %v980_v36, %v978_v35  ;;  %v1476_v48 = vpack.c.bf16 %v915_v46, %v913_v45  ;;  %v984_v51 = vld [vmem:[%s2226_s6 + $0x1b8] sm:$0xff]  ;;  %v1486_v35 = vpack.c.bf16 %v928_v34, %v926_v32  ;;  %v925_v36 = vld [vmem:[%s2225_s5 + $0x1e0] sm:$0xff] }
 0x273   : > { %v733_v49 = vmax.f32 %v730_v50, 0.0  ;;  %v982_v50 = vld [vmem:[%s2226_s6 + $0x1a8] sm:$0xff] }
 0x274   : > { %1411 = vmatprep.subr.bf16.mxu0 %v1410_v37  ;;  %v1414_v52 = vpack.c.bf16 %v984_v51, %v982_v50  ;;  %1477 = vmatpush1.bf16.msra.mxu1 %v1476_v48  ;;  %v927_v37 = vld [vmem:[%s2225_s5 + $0x1f0] sm:$0xff] }
 0x275   : > { %v737_v63 = vrot.slane %v733_v49, %v1883_v23  ;;  %v1981_v30 = vrot.slane %v733_v49, %v1954_v3  ;;  %1413 = vmatpush1.bf16.msra.mxu0 %v1412_v41  ;;  %v1478_v49 = vpack.c.bf16 %v920_v58, %v918_v57 }
 0x276   : > { %1415 = vmatprep.subr.bf16.mxu0 %v1414_v52 }
 0x277   : > { %743 = vbcast.lane.b32.xlu1 %v737_v63, 264  ;;  %739 = vbcast.lane.b32.xlu0 %v737_v63, 256 }
 0x278   : > { %1479 = vmatprep.subr.bf16.mxu1 %v1478_v49 }
 0x279   : > { %1417 = vmatpush1.bf16.msra.mxu0 %v1416_v39  ;;  %1481 = vmatpush1.bf16.msra.mxu1 %v1480_v59 }
 0x27a   : > { %1419 = vmatprep.subr.bf16.mxu0 %v1418_v62  ;;  %1483 = vmatprep.subr.bf16.mxu1 %v1482_v22 }
 0x27b   : > { %758 = vbcast.lane.b32.xlu1 %v1981_v30, 256  ;;  %747 = vbcast.lane.b32.xlu0 %v737_v63, 272 }
 0x27d   : > { %1485 = vmatpush1.bf16.msra.mxu1 %v1484_v27 }
 0x27e   : > { %1487 = vmatprep.subr.bf16.mxu1 %v1486_v35 }
 0x27f   : > { %762 = vbcast.lane.b32.xlu1 %v1981_v30, 264  ;;  %751 = vbcast.lane.b32.xlu0 %v737_v63, 280  ;;  %v985_v63 = vld [vmem:[%s2226_s6 + $0x1c0] sm:$0xff] }
 0x280   : > { %v1420_v10 = vpack.c.bf16 %v987_v7, %v985_v63 }
 0x282   : > { %1421 = vmatpush1.bf16.msra.mxu0 %v1420_v10 }
 0x283   : > { %766 = vbcast.lane.b32.xlu1 %v1981_v30, 272  ;;  %1423 = vmatprep.subr.bf16.mxu0 %v1422_v28 }
 0x286   : > { %1425 = vmatpush1.bf16.msra.mxu0 %v1424_v33 }
 0x287   : > { %770 = vbcast.lane.b32.xlu1 %v1981_v30, 280  ;;  %v1488_v30 = vpack.c.bf16 %v927_v37, %v925_v36 }
 0x289   : > { %1489 = vmatpush1.bf16.msra.mxu1 %v1488_v30 }
 0x2e9   : > { %v744_v38 = vpop.permute.xlu1 %743  ;;  %v740_v40 = vpop.permute.xlu0 %739 }
 0x2ea   : > { %v2090_v41 = vmul.f32 %v744_v38, %v1596_v8  ;;  %v2093_v42 = vmul.f32 %v744_v38, %v1598_v9  ;;  %v2096_v43 = vmul.f32 %v740_v40, %v1584_v2  ;;  %v2099_v44 = vmul.f32 %v740_v40, %v1588_v4 }
 0x2ec   : > { %v788_v8 = vadd.f32 %v2090_v41, %v2096_v43  ;;  %v797_v9 = vadd.f32 %v2093_v42, %v2099_v44  ;;  %v829_v2 = vmax.f32 %v2096_v43, %v2090_v41  ;;  %v838_v4 = vmax.f32 %v2099_v44, %v2093_v42 }
 0x2ed   : > { %v759_v45 = vpop.permute.xlu1 %758  ;;  %v748_v46 = vpop.permute.xlu0 %747 }
 0x2ee   : > { %v2102_v48 = vmul.f32 %v748_v46, %v1608_v14  ;;  %v2105_v50 = vmul.f32 %v748_v46, %v1610_v15 }
 0x2f0   : > { %v789_v39 = vadd.f32 %v788_v8, %v2102_v48  ;;  %v798_v57 = vadd.f32 %v797_v9, %v2105_v50  ;;  %v830_v58 = vmax.f32 %v829_v2, %v2102_v48  ;;  %v839_v49 = vmax.f32 %v838_v4, %v2105_v50 }
 0x2f1   : > { %v763_v51 = vpop.permute.xlu1 %762  ;;  %v752_v52 = vpop.permute.xlu0 %751 }
 0x2f2   : > { %v2116_v14 = vmul.f32 %v763_v51, %v1590_v5  ;;  %v2119_v15 = vmul.f32 %v763_v51, %v1592_v6  ;;  %v2122_v54 = vmul.f32 %v752_v52, %v1620_v20  ;;  %v2125_v56 = vmul.f32 %v752_v52, %v1622_v21 }
 0x2f3   : > { %v2132_v5 = vmul.f32 %v759_v45, %v1580_v0  ;;  %v2135_v6 = vmul.f32 %v759_v45, %v1582_v1 }
 0x2f4   : > { %v790_v20 = vadd.f32 %v789_v39, %v2122_v54  ;;  %v799_v53 = vadd.f32 %v798_v57, %v2125_v56  ;;  %v831_v21 = vmax.f32 %v830_v58, %v2122_v54  ;;  %v840_v55 = vmax.f32 %v839_v49, %v2125_v56 }
 0x2f5   : > { %v767_v59 = vpop.permute.xlu1 %766  ;;  %v806_v60 = vadd.f32 %v2116_v14, %v2132_v5  ;;  %v815_v61 = vadd.f32 %v2119_v15, %v2135_v6  ;;  %v847_v11 = vmax.f32 %v2132_v5, %v2116_v14  ;;  %v856_v16 = vmax.f32 %v2135_v6, %v2119_v15 }
 0x2f6   : > { %v2146_v0 = vmul.f32 %v767_v59, %v1604_v12  ;;  %v2149_v1 = vmul.f32 %v767_v59, %v1606_v13  ;;  %v791_v62 = vrot.slane %v790_v20, 4  ;;  %v800_v63 = vrot.slane %v799_v53, 4 }
 0x2f7   : > { %v832_v7 = vrot.slane %v831_v21, 4  ;;  %v841_v10 = vrot.slane %v840_v55, 4 }
 0x2f8   : > { %v807_v17 = vadd.f32 %v806_v60, %v2146_v0  ;;  %v816_v22 = vadd.f32 %v815_v61, %v2149_v1  ;;  %v792_v24 = vadd.f32 %v791_v62, %v790_v20  ;;  %v801_v12 = vadd.f32 %v800_v63, %v799_v53 }
 0x2f9   : > { %v833_v25 = vmax.f32 %v831_v21, %v832_v7  ;;  %v842_v26 = vmax.f32 %v840_v55, %v841_v10  ;;  %v771_v13 = vpop.permute.xlu1 %770  ;;  %v848_v27 = vmax.f32 %v847_v11, %v2146_v0  ;;  %v857_v28 = vmax.f32 %v856_v16, %v2149_v1 }
 0x2fa   : > { %v2160_v29 = vmul.f32 %v771_v13, %v1616_v18  ;;  %v2163_v31 = vmul.f32 %v771_v13, %v1618_v19  ;;  %v793_v32 = vrot.slane %v792_v24, 2  ;;  %v802_v33 = vrot.slane %v801_v12, 2 }
 0x2fb   : > { %v834_v34 = vrot.slane %v833_v25, 2  ;;  %v843_v35 = vrot.slane %v842_v26, 2 }
 0x2fc   : > { %v808_v36 = vadd.f32 %v807_v17, %v2160_v29  ;;  %v817_v37 = vadd.f32 %v816_v22, %v2163_v31  ;;  %v849_v30 = vmax.f32 %v848_v27, %v2160_v29  ;;  %v858_v38 = vmax.f32 %v857_v28, %v2163_v31 }
 0x2fd   : > { %v794_v40 = vadd.f32 %v793_v32, %v792_v24  ;;  %v803_v45 = vadd.f32 %v802_v33, %v801_v12  ;;  %v835_v19 = vmax.f32 %v833_v25, %v834_v34  ;;  %v844_v2 = vmax.f32 %v842_v26, %v843_v35 }
 0x2fe   : > { %v809_v46 = vrot.slane %v808_v36, 4  ;;  %v818_v18 = vrot.slane %v817_v37, 4  ;;  %v850_v8 = vrot.slane %v849_v30, 4  ;;  %v859_v9 = vrot.slane %v858_v38, 4 }
 0x2ff   : > { %v804_v57 = vrot.slane %v803_v45, 1  ;;  %v795_v58 = vrot.slane %v794_v40, 1  ;;  %v845_v55 = vrot.slane %v844_v2, 1  ;;  %v836_v59 = vrot.slane %v835_v19, 1 }
 0x300   : > { %v810_v4 = vadd.f32 %v809_v46, %v808_v36  ;;  %v819_v51 = vadd.f32 %v818_v18, %v817_v37  ;;  %v851_v52 = vmax.f32 %v849_v30, %v850_v8  ;;  %v860_v39 = vmax.f32 %v858_v38, %v859_v9 }
 0x301   : > { %v805_v7 = vadd.f32 %v804_v57, %v803_v45  ;;  %v796_v10 = vadd.f32 %v795_v58, %v794_v40  ;;  %v846_v24 = vmax.f32 %v844_v2, %v845_v55  ;;  %v837_v12 = vmax.f32 %v835_v19, %v836_v59 }
 0x302   : > { %v811_v49 = vrot.slane %v810_v4, 2  ;;  %v820_v20 = vrot.slane %v819_v51, 2  ;;  %v852_v53 = vrot.slane %v851_v52, 2  ;;  %v861_v21 = vrot.slane %v860_v39, 2 }
 0x303   : > { %v826_v28 = vmul.f32 0.03125, %v805_v7  ;;  %v825_v32 = vmul.f32 0.03125, %v796_v10  ;;  %v1515_v40 = vmov 1966171168   ;;  %v1152_v8 = vstv %s1151_s23 }
 0x304   : > { %v812_v60 = vadd.f32 %v811_v49, %v810_v4  ;;  %v853_v61 = vmax.f32 %v851_v52, %v852_v53  ;;  %v862_v62 = vmax.f32 %v860_v39, %v861_v21  ;;  %v821_v63 = vadd.f32 %v820_v20, %v819_v51 }
 0x305   : > { %v1161_v45 = vunpack.c.l.s4 %v1515_v40 }
 0x306   : > { %v863_v11 = vrot.slane %v862_v62, 1  ;;  %v854_v16 = vrot.slane %v853_v61, 1  ;;  %v822_v17 = vrot.slane %v821_v63, 1  ;;  %v813_v22 = vrot.slane %v812_v60, 1 }
 0x307   : > { %v1162_v4 = vunpack.c.0.s8 %v1161_v45 }
 0x308   : > { %v864_v25 = vmax.f32 %v862_v62, %v863_v11  ;;  %v855_v26 = vmax.f32 %v853_v61, %v854_v16  ;;  %v823_v13 = vadd.f32 %v822_v17, %v821_v63  ;;  %v814_v27 = vadd.f32 %v813_v22, %v812_v60 }
 0x309   : > { %v1165_v58 = vsub.s32 %v1162_v4, %v1658_v47 }
 0x30a   : > { %v998_v33 = vsel %vm453_vm4, %v864_v25, %v846_v24  ;;  %v997_v34 = vsel %vm453_vm4, %v855_v26, %v837_v12  ;;  %v828_v35 = vmul.f32 0.03125, %v823_v13  ;;  %v827_v36 = vmul.f32 0.03125, %v814_v27 }
 0x30b   : > { %1065 = vmatprep.mubr.f32.mxu0 %v998_v33 }
 0x30c   : > { %1066 = vmatmul.mubr.f32.vlgmr.msra.gmra.mrb[4].mxu0 %v997_v34  ;;  %v1077_v37 = vsel %vm453_vm4, %v828_v35, %v826_v28  ;;  %v1076_v30 = vsel %vm453_vm4, %v827_v36, %v825_v32 }
 0x30d   : > { %1144 = vmatprep.mubr.f32.mxu1 %v1077_v37 }
 0x30e   : > { %1145 = vmatmul.mubr.f32.vlgmr.msra.gmra.mrb[2].mxu1 %v1076_v30 }
 0x3df   : > { %v1067_v38 = vpop.f32.mrb[4].mxu0 }
 0x3e0   : > { %v1069_v46 = vpop.f32.mrb[5].mxu0 }
 0x3e1   : > { %v1146_v18 = vpop.f32.mrb[2].mxu1 }
 0x3e2   : > { %v1147_v9 = vadd.f32 %v1146_v18, %v1067_v38  ;;  %v1148_v19 = vpop.f32.mrb[3].mxu1 }
 0x3e3   : > { %v1149_v2 = vadd.f32 %v1148_v19, %v1069_v46 }
 0x3e4   : > { %v1153_v51 = vadd.f32 %v1152_v8, %v1147_v9 }
 0x3e5   : > { %v1154_v52 = vadd.f32 %v1152_v8, %v1149_v2 }
 0x3e6   : > { %v1155_v39 = vmax.f32 %v1153_v51, 0.0 }
 0x3e7   : > { %v1156_v57 = vmax.f32 %v1154_v52, 0.0 }
 0x3e9   : > { %v1159_v49 = vcombine.low %v1155_v39, %v1156_v57 }
 0x3eb   : > { %v1166_v20 = vrot.slane %v1159_v49, %v1165_v58 }
 0x3ed   : > { %v1167_v53 = vcombine.high %v1166_v20, %v1166_v20  ;;  %v1174_v21 = vrot.slane %v1166_v20, %v1165_v58 }
 0x3ef   : > { %v1181_v55 = vrot.slane %v1167_v53, %v1165_v58  ;;  %v1185_v59 = vrot.slane %v1174_v21, %v1883_v23  ;;  %v1189_v60 = vrot.slane %v1174_v21, %v1954_v3 }
 0x3f1   : > { %v1193_v61 = vrot.slane %v1181_v55, %v1883_v23  ;;  %v1197_v47 = vrot.slane %v1181_v55, %v1954_v3  ;;  %v1202_v62 = vmul.f32 %v1185_v59, %v2096_v43  ;;  %v1203_v63 = vmul.f32 %v1189_v60, %v2099_v44 }
 0x3f2   : > { %v1204_v7 = vmul.f32 %v1185_v59, %v2090_v41  ;;  %v1205_v10 = vmul.f32 %v1189_v60, %v2093_v42  ;;  %v1206_v11 = vmul.f32 %v1185_v59, %v2102_v48  ;;  %v1207_v16 = vmul.f32 %v1189_v60, %v2105_v50 }
 0x3f3   : > { %v1208_v23 = vmul.f32 %v1185_v59, %v2122_v54  ;;  %v1209_v3 = vmul.f32 %v1189_v60, %v2125_v56  ;;  %v1210_v43 = vmul.f32 %v1193_v61, %v2132_v5  ;;  %v1211_v44 = vmul.f32 %v1197_v47, %v2135_v6  ;;  %1218 = vst [vmem:[%s2181_s26] sm:$0xff] %v1202_v62 }
 0x3f4   : > { %1219 = vst [vmem:[%s2181_s26 + $0x8] sm:$0xff] %v1203_v63  ;;  %v1212_v41 = vmul.f32 %v1193_v61, %v2116_v14  ;;  %v1213_v42 = vmul.f32 %v1197_v47, %v2119_v15  ;;  %v1214_v48 = vmul.f32 %v1193_v61, %v2146_v0  ;;  %v1215_v50 = vmul.f32 %v1197_v47, %v2149_v1 }
 0x3f5   : > { %1220 = vst [vmem:[%s2181_s26 + $0x10] sm:$0xff] %v1204_v7  ;;  %1221 = vst [vmem:[%s2181_s26 + $0x18] sm:$0xff] %v1205_v10  ;;  %v1216_v54 = vmul.f32 %v1193_v61, %v2160_v29  ;;  %v1217_v56 = vmul.f32 %v1197_v47, %v2163_v31 }
 0x3f6   : > { %1222 = vst [vmem:[%s2181_s26 + $0x20] sm:$0xff] %v1206_v11  ;;  %1223 = vst [vmem:[%s2181_s26 + $0x28] sm:$0xff] %v1207_v16 }
 0x3f7   : > { %1224 = vst [vmem:[%s2181_s26 + $0x30] sm:$0xff] %v1208_v23  ;;  %1225 = vst [vmem:[%s2181_s26 + $0x38] sm:$0xff] %v1209_v3 }
 0x3f8   : > { %1226 = vst [vmem:[%s2181_s26 + $0x40] sm:$0xff] %v1210_v43  ;;  %1227 = vst [vmem:[%s2181_s26 + $0x48] sm:$0xff] %v1211_v44 }
 0x3f9   : > { %1228 = vst [vmem:[%s2181_s26 + $0x50] sm:$0xff] %v1212_v41  ;;  %1229 = vst [vmem:[%s2181_s26 + $0x58] sm:$0xff] %v1213_v42 }
 0x3fa   : > { %1230 = vst [vmem:[%s2181_s26 + $0x60] sm:$0xff] %v1214_v48  ;;  %1231 = vst [vmem:[%s2181_s26 + $0x68] sm:$0xff] %v1215_v50 }
 0x3fb   : > { %1232 = vst [vmem:[%s2181_s26 + $0x70] sm:$0xff] %v1216_v54  ;;  %1233 = vst [vmem:[%s2181_s26 + $0x78] sm:$0xff] %v1217_v56 }
 0x3fc PF: > { %s19_s29 = sadd.s32 1, %s1510_s29  }
 0x3fd   : > { %p16_p4 = scmp.ge.s32.totalorder %s19_s29, 4  }
 0x3ff   :  { %18 = sbr.rel (!%p16_p4) target bundleno = 2 (0x2), region = 82 }

</bundles_post_ra>
